<compile_context>
chip_gen: v5e
topology: v5e:2x2
jax: 0.10.0
libtpu: 0.0.40
codegen_flags: <defaults>
</compile_context>

<pallas_src>
import math
import numpy as np
import jax
import jax.numpy as jnp
from jax.experimental import pallas as pl
from jax.experimental.pallas import tpu as pltpu

_LANE = 128                      # TPU vreg lane width
_VMEM_TARGET_BYTES = 44 << 20    # keep total buffers well under v7x's 64 MiB physical


def _round_up(x, m):
    return (x + m - 1) // m * m


def _pick_tile(n):
    """Largest square A_hat tile; prefer >=4 row tiles (v7x megacore slack), accept >=2."""
    for t in (1024, 512, 256, 128):
        if n >= 4 * t:
            return t
    for t in (1024, 512, 256, 128):
        if n >= 2 * t:
            return t
    return _LANE


def _vmem_plan(tile_n, n_p, c_in_p, c_out_p):
    """Deterministic VMEM budget: decide X residency + the scoped limit to request."""
    a_bytes = 2 * tile_n * tile_n * 2                 # bf16 A tile, double-buffered
    w_bytes = 2 * c_in_p * c_out_p * 2                # bf16 W, resident (2 bufs worst case)
    b_bytes = 2 * 8 * c_out_p * 4                     # bias, sublane-padded
    acc_bytes = tile_n * c_in_p * 4                   # f32 scratch accumulator
    out_bytes = 2 * tile_n * c_out_p * 4              # f32 output tile, double-buffered
    base = a_bytes + w_bytes + b_bytes + acc_bytes + out_bytes
    x_resident_bytes = 2 * n_p * c_in_p * 2           # whole X resident (worst-case 2 bufs)
    x_stream_bytes = 2 * tile_n * c_in_p * 2          # streamed X tile
    x_resident = (base + x_resident_bytes) <= _VMEM_TARGET_BYTES
    total = base + (x_resident_bytes if x_resident else x_stream_bytes)
    vmem_limit = int(min(max(total + (4 << 20), 32 << 20), 60 << 20))
    return x_resident, vmem_limit


def _make_gcn_kernel(tile_n, x_resident):
    """One (row-tile i, reduction-tile k) step of  out = (A_hat @ X) @ W + b."""

    def kernel(a_ref, x_ref, w_ref, b_ref, o_ref, acc_ref):
        k = pl.program_id(1)

        if x_resident:
            # X is fully resident in VMEM; slice the k-th reduction chunk.
            r0 = pl.multiple_of(k * tile_n, tile_n)
            x_blk = x_ref[pl.ds(r0, tile_n), :]
        else:
            x_blk = x_ref[...]

        # Message passing / aggregation: A_hat[i, k] @ X[k]   (bf16 MXU, f32 acc)
        prod = jnp.dot(a_ref[...], x_blk, preferred_element_type=jnp.float32)

        @pl.when(k == 0)
        def _first():
            acc_ref[...] = prod          # no separate zero memset

        @pl.when(k > 0)
        def _accum():
            acc_ref[...] += prod

        # Epilogue runs exactly once per output tile: dense transform + bias.
        @pl.when(k == pl.num_programs(1) - 1)
        def _finish():
            out = jnp.dot(acc_ref[...].astype(jnp.bfloat16), w_ref[...],
                          preferred_element_type=jnp.float32)
            o_ref[...] = (out + b_ref[...]).astype(o_ref.dtype)

    return kernel


def gnn_layer_forward(a_hat, x, weight, bias, *, tile_n=None):
    """GNNLayer forward (eval, transform_first=False): (A_hat @ x) @ weight + bias.

    a_hat: [N_p, N_p] (ideally already padded + bf16 from build_normalized_adjacency),
    x: [N, Cin] f32, weight: [Cin, Cout] f32, bias: [Cout] f32.
    """
    n, c_in = x.shape
    c_out = weight.shape[1]

    if tile_n is None:
        tile_n = _pick_tile(n)

    n_p = _round_up(max(n, a_hat.shape[0]), tile_n)
    c_in_p = _round_up(c_in, _LANE)
    c_out_p = _round_up(c_out, _LANE)

    # A_hat: cast-before-pad only if the caller did not already provide padded bf16.
    a_p = a_hat if a_hat.dtype == jnp.bfloat16 else a_hat.astype(jnp.bfloat16)
    if a_p.shape != (n_p, n_p):
        a_p = jnp.pad(a_p, ((0, n_p - a_p.shape[0]), (0, n_p - a_p.shape[1])))

    # bf16 for the bandwidth-dominant operands (cast before pad); bias stays f32.
    x_p = jnp.pad(x.astype(jnp.bfloat16), ((0, n_p - n), (0, c_in_p - c_in)))
    w_p = jnp.pad(weight.astype(jnp.bfloat16),
                  ((0, c_in_p - c_in), (0, c_out_p - c_out)))
    b_p = jnp.pad(bias.astype(jnp.float32), (0, c_out_p - c_out)).reshape(1, c_out_p)

    x_resident, vmem_limit = _vmem_plan(tile_n, n_p, c_in_p, c_out_p)

    if x_resident:
        # Block index constant across the grid -> X is DMA'd into VMEM exactly once.
        x_spec = pl.BlockSpec((n_p, c_in_p), lambda i, k: (0, 0))
    else:
        x_spec = pl.BlockSpec((tile_n, c_in_p), lambda i, k: (k, 0))

    grid = (n_p // tile_n, n_p // tile_n)  # (row tiles, reduction tiles) — reduction last

    out_p = pl.pallas_call(
        _make_gcn_kernel(tile_n, x_resident),
        out_shape=jax.ShapeDtypeStruct((n_p, c_out_p), jnp.float32),
        grid_spec=pltpu.PrefetchScalarGridSpec(
            num_scalar_prefetch=0,
            grid=grid,
            in_specs=[
                pl.BlockSpec((tile_n, tile_n), lambda i, k: (i, k)),      # A_hat tile
                x_spec,                                                   # X (resident/stream)
                pl.BlockSpec((c_in_p, c_out_p), lambda i, k: (0, 0)),     # W (resident)
                pl.BlockSpec((1, c_out_p), lambda i, k: (0, 0)),          # bias (resident)
            ],
            out_specs=pl.BlockSpec((tile_n, c_out_p), lambda i, k: (i, 0)),
            scratch_shapes=[pltpu.VMEM((tile_n, c_in_p), jnp.float32)],   # f32 accumulator
        ),
        compiler_params=pltpu.CompilerParams(
            dimension_semantics=("parallel", "arbitrary"),
            vmem_limit_bytes=vmem_limit),
    )(a_p, x_p, w_p, b_p)

    return out_p[:n, :c_out]


def build_normalized_adjacency(edge_index, num_nodes, *, padded_nodes=None,
                               dtype=jnp.bfloat16):
    """ModelPretreatment: remove self-loops, add self-loops, sym-normalize.

    Returns dense A_hat [N_p, N_p] (padded_nodes >= num_nodes) with
    A_hat[col (target), row (source)] = norm.  Duplicate edges are summed
    (scatter-add semantics, matching PyG).  Built fully on the host, padded
    and cast there so the device never runs an O(N^2) pad/cast op.
    """
    ei = np.asarray(edge_index)
    row, col = ei[0], ei[1]
    keep = row != col
    row, col = row[keep], col[keep]
    loop = np.arange(num_nodes, dtype=row.dtype)
    row = np.concatenate([row, loop])
    col = np.concatenate([col, loop])
    deg = np.zeros(num_nodes, dtype=np.float32)
    np.add.at(deg, col, 1.0)
    deg_inv_sqrt = deg ** -0.5
    deg_inv_sqrt[~np.isfinite(deg_inv_sqrt)] = 0.0
    w = deg_inv_sqrt[row] * deg_inv_sqrt[col]
    n_p = padded_nodes if padded_nodes is not None else num_nodes
    a_hat = np.zeros((n_p, n_p), dtype=np.float32)
    np.add.at(a_hat, (col, row), w)          # y[target] += w * x[source]
    return jnp.asarray(a_hat.astype(dtype))  # host-side cast (ml_dtypes bf16 for default)


def init_params(key, in_channels, out_channels, heads=1):
    fan_in = heads * in_channels
    fan_out = heads * out_channels
    stdv = math.sqrt(6.0 / (fan_in + fan_out))
    weight = jax.random.uniform(key, (fan_in, fan_out), jnp.float32,
                                minval=-stdv, maxval=stdv)
    bias = jnp.zeros((fan_out,), jnp.float32)
    return weight, bias


if __name__ == "__main__":
    N = 200          # nodes (padded to 256 internally -> 2x2 tile grid)
    C_IN = 32        # in_channels  (lane-padded to 128 internally)
    C_OUT = 32       # out_channels (lane-padded to 128 internally)
    HEADS = 1

    key = jax.random.PRNGKey(0)
    kx, kw = jax.random.split(key)

    # node features [N, C_IN]
    x = jax.random.normal(kx, (N, C_IN), jnp.float32)

    # deterministic graph: ring + random chords (directed edges [2, E])
    rng = np.random.default_rng(0)
    ring_src = np.arange(N)
    ring_dst = (np.arange(N) + 1) % N
    chord_src = rng.integers(0, N, size=3 * N)
    chord_dst = rng.integers(0, N, size=3 * N)
    edge_index = np.stack([np.concatenate([ring_src, chord_src]),
                           np.concatenate([ring_dst, chord_dst])]).astype(np.int64)

    tile_n = _pick_tile(N)
    n_p = _round_up(N, tile_n)

    # A_hat built pre-padded + bf16 on the host (no device-side pad/cast ops).
    a_hat = build_normalized_adjacency(edge_index, N, padded_nodes=n_p,
                                       dtype=jnp.bfloat16)
    weight, bias = init_params(kw, C_IN, C_OUT, HEADS)

    out = gnn_layer_forward(a_hat, x, weight, bias, tile_n=tile_n)
    out = jax.block_until_ready(out)
    assert out.shape == (N, HEADS * C_OUT)
    out_np = np.asarray(out)

    # --- Reference 1: rounding-matched (validates kernel mechanics, tight tol) ---
    a32 = a_hat.astype(jnp.float32)[:N, :N]                       # bf16-rounded A_hat
    x32 = x.astype(jnp.bfloat16).astype(jnp.float32)
    w32 = weight.astype(jnp.bfloat16).astype(jnp.float32)
    acc_ref = jnp.dot(a32, x32)                                   # f32 accumulation
    ref_matched = jnp.dot(acc_ref.astype(jnp.bfloat16).astype(jnp.float32), w32) + bias
    np.testing.assert_allclose(out_np, np.asarray(ref_matched), rtol=5e-3, atol=5e-3)

    # --- Reference 2: true f32 GNNLayer (validates bf16 storage choice, loose tol) ---
    a_f32 = build_normalized_adjacency(edge_index, N, dtype=np.float32)   # unpadded f32
    ref_true = jnp.dot(jnp.dot(a_f32, x), weight) + bias
    np.testing.assert_allclose(out_np, np.asarray(ref_true), rtol=3e-2, atol=3e-2)

    print("KERNEL_OK")
</pallas_src>

<mosaic_0001>
module attributes {stable_mosaic.version = 11 : i64} {
  func.func @kernel(%arg0: i32, %arg1: i32, %arg2: memref<128x128xbf16, #tpu.memory_space<vmem>>, %arg3: memref<256x128xbf16, #tpu.memory_space<vmem>>, %arg4: memref<128x128xbf16, #tpu.memory_space<vmem>>, %arg5: memref<1x128xf32, #tpu.memory_space<vmem>>, %arg6: memref<128x128xf32, #tpu.memory_space<vmem>>, %arg7: memref<128x128xf32, #tpu.memory_space<vmem>>) attributes {dimension_semantics = [#tpu.dimension_semantics<parallel>, #tpu.dimension_semantics<arbitrary>], iteration_bounds = array<i64: 2, 2>, scalar_prefetch = 0 : i64, scratch_operands = 1 : i64, tpu.core_type = #tpu.core_type<tc>, window_params = [{transform_indices = @transform_0, window_bounds = array<i64: 128, 128>}, {pipeline_mode = #tpu.pipeline_mode<synchronous>, transform_indices = @transform_1, window_bounds = array<i64: 256, 128>}, {pipeline_mode = #tpu.pipeline_mode<synchronous>, transform_indices = @transform_2, window_bounds = array<i64: 128, 128>}, {pipeline_mode = #tpu.pipeline_mode<synchronous>, transform_indices = @transform_3, window_bounds = array<i64: 1, 128>}, {transform_indices = @transform_4, window_bounds = array<i64: 128, 128>}]} {
    %c128_i32 = arith.constant 128 : i32
    %0 = arith.muli %arg1, %c128_i32 : i32
    %1 = tpu.assume_multiple %0, 128 : i32
    %2 = arith.index_cast %1 : i32 to index
    %c0 = arith.constant 0 : index
    %3 = vector.load %arg3[%2, %c0] : memref<256x128xbf16, #tpu.memory_space<vmem>>, vector<128x128xbf16>
    %c0_0 = arith.constant 0 : index
    %c0_1 = arith.constant 0 : index
    %4 = vector.load %arg2[%c0_0, %c0_1] : memref<128x128xbf16, #tpu.memory_space<vmem>>, vector<128x128xbf16>
    %cst = arith.constant dense<0.000000e+00> : vector<128x128xf32>
    %5 = tpu.matmul %4, %3, %cst {dimension_numbers = #tpu.dot_dimension_numbers<[1], [0], [0], [1], [0, 0, 1, 1], [], []>} : vector<128x128xbf16>, vector<128x128xbf16>, vector<128x128xf32> -> vector<128x128xf32>
    %c0_i32 = arith.constant 0 : i32
    %6 = arith.cmpi eq, %arg1, %c0_i32 : i32
    %7 = arith.extui %6 : i1 to i32
    %c0_i32_2 = arith.constant 0 : i32
    %8 = arith.cmpi ne, %7, %c0_i32_2 : i32
    scf.if %8 {
      %c0_6 = arith.constant 0 : index
      %c0_7 = arith.constant 0 : index
      %15 = vector.load %arg7[%c0_6, %c0_7] : memref<128x128xf32, #tpu.memory_space<vmem>>, vector<128x128xf32>
      tpu.vector_store %arg7[%c0_6, %c0_7], %5 {strides = array<i32>} : memref<128x128xf32, #tpu.memory_space<vmem>>, vector<128x128xf32>,
    } else {
    }
    %c0_i32_3 = arith.constant 0 : i32
    %9 = arith.cmpi sgt, %arg1, %c0_i32_3 : i32
    %10 = arith.extui %9 : i1 to i32
    %c0_i32_4 = arith.constant 0 : i32
    %11 = arith.cmpi ne, %10, %c0_i32_4 : i32
    scf.if %11 {
      %c0_6 = arith.constant 0 : index
      %c0_7 = arith.constant 0 : index
      %15 = vector.load %arg7[%c0_6, %c0_7] : memref<128x128xf32, #tpu.memory_space<vmem>>, vector<128x128xf32>
      %16 = arith.addf %15, %5 : vector<128x128xf32>
      %c0_8 = arith.constant 0 : index
      %c0_9 = arith.constant 0 : index
      %17 = vector.load %arg7[%c0_8, %c0_9] : memref<128x128xf32, #tpu.memory_space<vmem>>, vector<128x128xf32>
      tpu.vector_store %arg7[%c0_8, %c0_9], %16 {strides = array<i32>} : memref<128x128xf32, #tpu.memory_space<vmem>>, vector<128x128xf32>,
    } else {
    }
    %c1_i32 = arith.constant 1 : i32
    %12 = arith.cmpi eq, %arg1, %c1_i32 : i32
    %13 = arith.extui %12 : i1 to i32
    %c0_i32_5 = arith.constant 0 : i32
    %14 = arith.cmpi ne, %13, %c0_i32_5 : i32
    scf.if %14 {
      %c0_6 = arith.constant 0 : index
      %c0_7 = arith.constant 0 : index
      %15 = vector.load %arg7[%c0_6, %c0_7] : memref<128x128xf32, #tpu.memory_space<vmem>>, vector<128x128xf32>
      %16 = arith.truncf %15 : vector<128x128xf32> to vector<128x128xbf16>
      %c0_8 = arith.constant 0 : index
      %c0_9 = arith.constant 0 : index
      %17 = vector.load %arg4[%c0_8, %c0_9] : memref<128x128xbf16, #tpu.memory_space<vmem>>, vector<128x128xbf16>
      %cst_10 = arith.constant dense<0.000000e+00> : vector<128x128xf32>
      %18 = tpu.matmul %16, %17, %cst_10 {dimension_numbers = #tpu.dot_dimension_numbers<[1], [0], [0], [1], [0, 0, 1, 1], [], []>} : vector<128x128xbf16>, vector<128x128xbf16>, vector<128x128xf32> -> vector<128x128xf32>
      %c0_11 = arith.constant 0 : index
      %c0_12 = arith.constant 0 : index
      %19 = vector.load %arg5[%c0_11, %c0_12] : memref<1x128xf32, #tpu.memory_space<vmem>>, vector<1x128xf32>
      %20 = vector.broadcast %19 : vector<1x128xf32> to vector<128x128xf32>
      %21 = arith.addf %18, %20 : vector<128x128xf32>
      %c0_13 = arith.constant 0 : index
      %c0_14 = arith.constant 0 : index
      %22 = vector.load %arg6[%c0_13, %c0_14] : memref<128x128xf32, #tpu.memory_space<vmem>>, vector<128x128xf32>
      tpu.vector_store %arg6[%c0_13, %c0_14], %21 {strides = array<i32>} : memref<128x128xf32, #tpu.memory_space<vmem>>, vector<128x128xf32>,
    } else {
    }
    return
  }
  func.func @transform_0(%arg0: i32, %arg1: i32) -> (i32, i32) {
    %c0_i32 = arith.constant 0 : i32
    return %arg0, %arg1 : i32, i32
  }
  func.func @transform_1(%arg0: i32, %arg1: i32) -> (i32, i32) {
    %c0_i32 = arith.constant 0 : i32
    %c0_i32_0 = arith.constant 0 : i32
    %c0_i32_1 = arith.constant 0 : i32
    return %c0_i32, %c0_i32_0 : i32, i32
  }
  func.func @transform_2(%arg0: i32, %arg1: i32) -> (i32, i32) {
    %c0_i32 = arith.constant 0 : i32
    %c0_i32_0 = arith.constant 0 : i32
    %c0_i32_1 = arith.constant 0 : i32
    return %c0_i32, %c0_i32_0 : i32, i32
  }
  func.func @transform_3(%arg0: i32, %arg1: i32) -> (i32, i32) {
    %c0_i32 = arith.constant 0 : i32
    %c0_i32_0 = arith.constant 0 : i32
    %c0_i32_1 = arith.constant 0 : i32
    return %c0_i32, %c0_i32_0 : i32, i32
  }
  func.func @transform_4(%arg0: i32, %arg1: i32) -> (i32, i32) {
    %c0_i32 = arith.constant 0 : i32
    %c0_i32_0 = arith.constant 0 : i32
    return %arg0, %c0_i32 : i32, i32
  }
}

</mosaic_0001>

<bundles_post_ra>
// kernel: tpu_custom_call.1
= control target key start
LH: loop header
LB: loop body
LE: loop exit
PB: predicated region body
PF: predicated region fallthrough
CT: control target
= control target key end

     0   :  { %s1652_s0 = inlined_call_operand.hbm [shape: bf16[256,256], index: 0, kind: input, shape index: {}]   ;;  %s1653_s1 = inlined_call_operand.hbm [shape: bf16[256,128], index: 1, kind: input, shape index: {}]   ;;  %s1654_s2 = inlined_call_operand.hbm [shape: bf16[128,128], index: 2, kind: input, shape index: {}]   ;;  %s1655_s3 = inlined_call_operand.vmem [shape: f32[1,128], index: 3, kind: input, shape index: {}]   ;;  %s1656_s4 = inlined_call_operand.hbm [shape: f32[256,128], index: 4, kind: output, shape index: {}]  }
   0x1   :  { %1666 = sst [smem:[#allocation19_spill]] %s1653_s1 }
   0x2   :  { %1667 = sst [smem:[#allocation20_spill]] %s1654_s2 }
   0x3   :  { %1668 = sst [smem:[#allocation21_spill]] %s1655_s3 }
   0x4   :  { %1669 = sst [smem:[#allocation22_spill]] %s1656_s4 }
   0x5   :  { %9 = vsyncpa [#allocation4], 0 }
   0x6   :  { %11 = vsyncpa [#allocation4 + $0x1], 0 }
   0x7   :  { %12 = vsyncpa [#allocation7], 0 }
   0x8   :  { %13 = vsyncpa [#allocation5], 0 }
   0x9   :  { %15 = vsyncpa [#allocation5 + $0x1], 0  ;;  %s1381_s15 = smov 0   ;;  %s1383_s16 = smov 0  }
   0xa   :  { %s1385_s17 = smov 0   ;;  %s1387_s18 = smov 0  }
   0xb   :  { %s1389_s19 = smov 0   ;;  %s1391_s20 = smov 0  }
   0xc   :  { %s1393_s21 = smov 0   ;;  %s1395_s22 = smov 0  }
   0xd   :  { %s1397_s23 = smov 0   ;;  %s1399_s24 = smov 0  }
   0xe   :  { %s1401_s25 = smov 0  }
   0xf LB: > { %1670 = sst [smem:[#allocation13_spill]] %s1307_s15  ;;  %s807_s26 = sadd.s32 4294967295, %s1347_s25   ;;  %s1347_s25 = sphi %s1401_s25, %s21_s25   ;;  %s1343_s24 = sphi %s1399_s24, %s1706_s24   ;;  %s1339_s23 = sphi %s1397_s23, %s1705_s23   ;;  %s1335_s22 = sphi %s1395_s22, %s1704_s22   ;;  %s1331_s21 = sphi %s1393_s21, %s1703_s21   ;;  %s1327_s20 = sphi %s1391_s20, %s1702_s20   ;;  %s1323_s19 = sphi %s1389_s19, %s1701_s19   ;;  %s1319_s18 = sphi %s1387_s18, %s1700_s18   ;;  %s1315_s17 = sphi %s1385_s17, %s1699_s17   ;;  %s1311_s16 = sphi %s1383_s16, %s1698_s16   ;;  %s1307_s15 = sphi %s1381_s15, %s1697_s15  }
  0x10   : > { %1671 = sst [smem:[#allocation14_spill]] %s1331_s21  ;;  %s808_s27 = sadd.s32 4294967294, %s1347_s25  }
  0x11   : > { %1672 = sst [smem:[#allocation15_spill]] %s1335_s22  ;;  %p55_p0 = scmp.ne.s32.totalorder %s1323_s19, %s1319_s18 }
  0x12   : > { %p1437_p1 = scmp.eq.s32.totalorder %s807_s26, 0  ;;  %p141_p2 = scmp.ne.s32.totalorder %s1315_s17, %s1311_s16 }
  0x13   : > { %p142_p3 = scmp.eq.s32.totalorder %s807_s26, 3  ;;  %p147_p5 = scmp.ne.s32.totalorder %s1311_s16, %s1307_s15 }
  0x14   : > { %p1445_p4 = por %p1437_p1, %p55_p0  ;;  %p148_p7 = scmp.eq.s32.totalorder %s808_s27, 3 }
  0x15   : > { %p1451_p6 = por %p142_p3, %p141_p2  ;;  %p809_p8 = scmp.ge.s32.totalorder %s1347_s25, 1 }
  0x16   : > { %p155_p9 = scmp.lt.s32.totalorder %s1347_s25, 5  ;;  %p1457_p10 = por %p148_p7, %p147_p5 }
  0x17   : > { %s1675_s30 = scalar_select %p1451_p6, 1, 0 }
  0x18   : > { %s1677_s5 = scalar_select %p1457_p10, 1, 0 }
  0x19   : > { %1676 = sst [smem:[#allocation16_spill]] %s1675_s30  ;;  %p1461_p11 = pnand %p809_p8, %p155_p9 }
  0x1a   : > { %1678 = sst [smem:[#allocation17_spill]] %s1677_s5  ;;  %s1349_s10 = smov [#allocation6]  }
  0x1b   : > { %s1680_s1 = sld [smem:[#allocation19_spill]]  ;;  %p1014_p12 = pneg %p1461_p11 }
  0x1c   : > { %s168_s11 = sshll.u32 %s1349_s10, 4  ;;  %s1681_s2 = sld [smem:[#allocation20_spill]]  ;;  %s169_s11 = int_to_ptr.vmem [resolvable:$true] %s168_s11 }
  0x1d   : > { %p1015_p13 = pnand %p1014_p12, %p1437_p1  ;;  %s1657_s18 = smov 64  }
  0x1e   : > { %s1658_s26 = smov 4   ;;  %s1352_s27 = smov [#allocation8]  }
  0x1f   : > { %s182_s7 = sshll.u32 %s1352_s27, 4  ;;  %s30_s8 = sadd.s32 1, %s1339_s23  ;;  %s183_s7 = int_to_ptr.vmem [resolvable:$true] %s182_s7 }
  0x20   : > { %p31_p0 = scmp.ge.s32.totalorder %s30_s8, 2  ;;  %s33_s10 = sadd.s32 1, %s1343_s24 }
  0x21   : > { %s166_s9 = sshll.u32 %s1680_s1, 4  ;;  %s42_s12 = sadd.s32 1, %s1327_s20  ;;  %s167_s9 = int_to_ptr.hbm [resolvable:$true] %s166_s9 }
  0x22   : > { %s180_s14 = sshll.u32 %s1681_s2, 4  ;;  %p49_p2 = scmp.ne.s32.totalorder %s1327_s20, %s1323_s19  ;;  %s181_s14 = int_to_ptr.hbm [resolvable:$true] %s180_s14 }
  0x23   : > { %1017 = dma.hbm_to_vmem [thread:$0]  (!%p1015_p13), %s167_s9, 2048, %s169_s11, [#allocation7], %s1657_s18, %s1657_s18, %s1658_s26  }
  0x24   : > { %1020 = dma.hbm_to_vmem [thread:$0]  (!%p1015_p13), %s181_s14, 1024, %s183_s7, [#allocation7], %s1657_s18, %s1657_s18, %s1658_s26  }
  0x25   : > { %s1708_s8 = smov (%p31_p0, %s30_s8), 0  ;;  %s1710_s10 = smov (!%p31_p0, %s33_s10), %s1343_s24 }
  0x26   : > { %1682 = sst [smem:[#allocation18_spill]] %s1708_s8  ;;  %s38_s9 = ssub.s32 %s1339_s23, %s1708_s8 }
  0x27   : > { %p50_p3 = scmp.eq.s32.totalorder %s1347_s25, 0  ;;  %p35_p5 = scmp.ge.s32.totalorder %s1710_s10, 2 }
  0x28   : > { %s131_s11 = sadd.s32 1, %s1315_s17  ;;  %p1031_p8 = scmp.lt.s32.totalorder %s1347_s25, 4 }
  0x29   : > { %p1493_p7 = por %p50_p3, %p49_p2  ;;  %s1712_s10 = smov (%p35_p5, %s1710_s10), 0 }
  0x2a   : > { %s199_s14 = sand.u32 1, %s1327_s20   ;;  %s928_s27 = sshll.u32 %s1343_s24, 5 }
  0x2b   : > { %s37_s7 = ssub.s32 %s1343_s24, %s1712_s10  ;;  %s813_s26 = sshll.u32 %s199_s14, 6 }
  0x2c   : > { %s39_s18 = sor.u32 %s38_s9, %s37_s7  ;;  %p129_p9 = scmp.eq.s32.totalorder %s37_s7, 0 }
  0x2d   : > { %p40_p12 = scmp.eq.s32.totalorder %s39_s18, 0  ;;  %s208_s8 = sadd.s32 %s1339_s23, %s928_s27 }
  0x2e   : > { %s1505_s1 = scalar_select %p129_p9, %s1315_s17, %s131_s11  }
  0x2f   : > { %s1508_s2 = scalar_select %p40_p12, %s1327_s20, %s42_s12  }
  0x30   : > { %s816_s5 = sshll.u32 %s208_s8, 2  ;;  %s203_s15 = scalar_lea.vmem [#allocation3], %s813_s26 }
  0x31   : > { %s213_s4 = sshll.u32 %s203_s15, 4  ;;  %s210_s3 = scalar_lea.hbm %s1652_s0, %s816_s5  ;;  %s214_s4 = int_to_ptr.vmem [resolvable:$true] %s213_s4 }
  0x32   : > { %s211_s21 = sshll.u32 %s210_s3, 4  ;;  %p1022_p13 = pnand %p1031_p8, %p1493_p7  ;;  %s212_s21 = int_to_ptr.hbm [resolvable:$true] %s211_s21 }
  0x33   : > { %s200_s18 = scalar_lea.sflag [#allocation4], %s199_s14  ;;  %s1353_s9 = smov 128  }
  0x34   : > { %s1684_s11 = smov 4   ;;  %s1685_s7 = smov 64  }
  0x35   : > { %1024 = dma.hbm_to_vmem [thread:$0]  (!%p1022_p13), %s212_s21, 1024, %s214_s4, %s200_s18, %s1353_s9, %s1685_s7, %s1684_s11  }
  0x36   : > { %225 = sbr.rel (%p1461_p11) target bundleno = 537 (0x219), region = 36  ;;  %s227_s15 = sand.u32 (!%p1461_p11), 1, %s1323_s19  }
  0x37   : > { %s818_s26 = sshll.u32 (!%p1461_p11), %s227_s15, 6  ;;  %s228_s22 = scalar_lea.sflag (!%p1461_p11), [#allocation4], %s227_s15 }
  0x38   : > { %s1523_s30 = scalar_lea.vmem (!%p1461_p11), [#allocation3], %s818_s26 }
  0x3b   : > { %1294 = dma.done.wait (%p1445_p4), %s228_s22, 1024  }
  0x3c   : > { %1296 = vsyncadd (%p1445_p4), %s228_s22, 4294966272 }
  0x3d   : > { %1298 = dma.done.wait (%p1437_p1), [#allocation7], 3072  }
  0x3e   : > { %1300 = vsyncadd (%p1437_p1), [#allocation7], 4294964224  ;;  %s1686_s3 = sld [smem:[#allocation14_spill]]  ;;  %s264_s4 = sand.u32 1, %s1311_s16   ;;  %v937_v8 = vld [vmem:[%s1523_s30] sm:$0xff]  ;;  %v939_v9 = vld [vmem:[%s1523_s30 + $0x10] sm:$0xff] }
  0x3f   : > { %s1537_s5 = sshll.u32 %s264_s4, 7  ;;  %v941_v10 = vld [vmem:[%s1523_s30 + $0x20] sm:$0xff]  ;;  %v943_v11 = vld [vmem:[%s1523_s30 + $0x30] sm:$0xff]  ;;  %v938_v12 = vld [vmem:[%s1523_s30 + $0x8] sm:$0xff] }
  0x40   : > { %v940_v13 = vld [vmem:[%s1523_s30 + $0x18] sm:$0xff]  ;;  %v942_v14 = vld [vmem:[%s1523_s30 + $0x28] sm:$0xff]  ;;  %s1566_s28 = scalar_lea.vmem [#allocation9], %s1537_s5 }
  0x41   : > { %v944_v15 = vld [vmem:[%s1523_s30 + $0x38] sm:$0xff] }
  0x44   : > { %s822_s21 = sshll.u32 %s1686_s3, 7  ;;  %p888_p1 = scmp.ne.s32.totalorder %s1686_s3, 0 }
  0x45   : > { %s270_s6 = sshra.s32 %s822_s21, 3 }
  0x46   : > { %s823_s8 = sshll.u32 %s270_s6, 2 }
  0x47   : > { %s1539_s12 = scalar_lea.vmem [#allocation6], %s823_s8 }
  0x48   : > { %v936_v0 = vld [vmem:[%s1539_s12 + $0x38] sm:$0xff]  ;;  %v935_v1 = vld [vmem:[%s1539_s12 + $0x30] sm:$0xff]  ;;  %v934_v2 = vld [vmem:[%s1539_s12 + $0x28] sm:$0xff] }
  0x49   : > { %402 = vmatpush.bf16.msra.mxu0 %v936_v0  ;;  %954 = vmatpush.bf16.msra.mxu1 %v936_v0  ;;  %v933_v3 = vld [vmem:[%s1539_s12 + $0x20] sm:$0xff]  ;;  %v932_v4 = vld [vmem:[%s1539_s12 + $0x18] sm:$0xff]  ;;  %v931_v5 = vld [vmem:[%s1539_s12 + $0x10] sm:$0xff] }
  0x4a   : > { %955 = vmatpush.bf16.msra.mxu2 %v936_v0  ;;  %956 = vmatpush.bf16.msra.mxu3 %v936_v0  ;;  %v930_v6 = vld [vmem:[%s1539_s12 + $0x8] sm:$0xff]  ;;  %v929_v7 = vld [vmem:[%s1539_s12] sm:$0xff] }
  0x4d   : > { %403 = vmatpush.bf16.msra.mxu0 %v935_v1  ;;  %957 = vmatpush.bf16.msra.mxu1 %v935_v1 }
  0x4e   : > { %958 = vmatpush.bf16.msra.mxu2 %v935_v1  ;;  %959 = vmatpush.bf16.msra.mxu3 %v935_v1 }
  0x51   : > { %404 = vmatpush.bf16.msra.mxu0 %v934_v2  ;;  %960 = vmatpush.bf16.msra.mxu1 %v934_v2 }
  0x52   : > { %961 = vmatpush.bf16.msra.mxu2 %v934_v2  ;;  %962 = vmatpush.bf16.msra.mxu3 %v934_v2 }
  0x55   : > { %405 = vmatpush.bf16.msra.mxu0 %v933_v3  ;;  %963 = vmatpush.bf16.msra.mxu1 %v933_v3 }
  0x56   : > { %964 = vmatpush.bf16.msra.mxu2 %v933_v3  ;;  %965 = vmatpush.bf16.msra.mxu3 %v933_v3 }
  0x59   : > { %406 = vmatpush.bf16.msra.mxu0 %v932_v4  ;;  %966 = vmatpush.bf16.msra.mxu1 %v932_v4 }
  0x5a   : > { %967 = vmatpush.bf16.msra.mxu2 %v932_v4  ;;  %968 = vmatpush.bf16.msra.mxu3 %v932_v4 }
  0x5d   : > { %407 = vmatpush.bf16.msra.mxu0 %v931_v5  ;;  %969 = vmatpush.bf16.msra.mxu1 %v931_v5 }
  0x5e   : > { %970 = vmatpush.bf16.msra.mxu2 %v931_v5  ;;  %971 = vmatpush.bf16.msra.mxu3 %v931_v5 }
  0x61   : > { %408 = vmatpush.bf16.msra.mxu0 %v930_v6  ;;  %972 = vmatpush.bf16.msra.mxu1 %v930_v6 }
  0x62   : > { %973 = vmatpush.bf16.msra.mxu2 %v930_v6  ;;  %974 = vmatpush.bf16.msra.mxu3 %v930_v6 }
  0x65   : > { %409 = vmatpush.bf16.msra.mxu0 %v929_v7  ;;  %975 = vmatpush.bf16.msra.mxu1 %v929_v7 }
  0x66   : > { %976 = vmatpush.bf16.msra.mxu2 %v929_v7  ;;  %977 = vmatpush.bf16.msra.mxu3 %v929_v7 }
  0x68   : > { %410 = vmatmul.bf16.vlgmr.msra.gmra.mxu0 %v937_v8  ;;  %420 = vmatmul.bf16.vlgmr.msra.gmra.mxu1 %v939_v9 }
  0x69   : > { %430 = vmatmul.bf16.vlgmr.msra.gmra.mxu2 %v941_v10  ;;  %440 = vmatmul.bf16.vlgmr.msra.gmra.mxu3 %v943_v11 }
  0x78   : > { %415 = vmatmul.bf16.gmra.mxu0 %v938_v12  ;;  %425 = vmatmul.bf16.gmra.mxu1 %v940_v13 }
  0x79   : > { %435 = vmatmul.bf16.gmra.mxu2 %v942_v14  ;;  %445 = vmatmul.bf16.gmra.mxu3 %v944_v15 }
  0xe5   : > { %v411_v16 = vpop.f32.mrf.mxu0  ;;  %v421_v17 = vpop.f32.mrf.mxu1 }
  0xec   : > { %v431_v18 = vpop.f32.mrf.mxu2  ;;  %v1557_v19 = vpop.f32.mrf.mxu3 }
  0xed   : > { %v413_v20 = vpop.f32.mrf.mxu0  ;;  %v423_v21 = vpop.f32.mrf.mxu1 }
  0xf4   : > { %v433_v22 = vpop.f32.mrf.mxu2  ;;  %v1559_v23 = vpop.f32.mrf.mxu3 }
  0xf5   : > { %v416_v24 = vpop.f32.mrf.mxu0  ;;  %v426_v25 = vpop.f32.mrf.mxu1 }
  0xfc   : > { %v436_v26 = vpop.f32.mrf.mxu2  ;;  %v1561_v27 = vpop.f32.mrf.mxu3 }
  0xfd   : > { %v418_v28 = vpop.f32.mrf.mxu0  ;;  %v428_v29 = vpop.f32.mrf.mxu1 }
 0x100   : > { %454 = sbr.rel (%p888_p1) target bundleno = 277 (0x115), region = 52 }
 0x104   : > { %v438_v30 = vpop.f32.mrf.mxu2  ;;  %v1563_v31 = vpop.f32.mrf.mxu3 }
 0x105   : > { %455 = vst [vmem:[#allocation2 + $0x30] sm:$0xff] %v411_v16 }
 0x106   : > { %456 = vst [vmem:[#allocation2] sm:$0xff] %v413_v20 }
 0x107   : > { %457 = vst [vmem:[#allocation2 + $0x58] sm:$0xff] %v416_v24 }
 0x108   : > { %458 = vst [vmem:[#allocation2 + $0x18] sm:$0xff] %v418_v28 }
 0x109   : > { %459 = vst [vmem:[#allocation2 + $0x50] sm:$0xff] %v421_v17 }
 0x10a   : > { %460 = vst [vmem:[#allocation2 + $0x68] sm:$0xff] %v423_v21 }
 0x10b   : > { %461 = vst [vmem:[#allocation2 + $0x8] sm:$0xff] %v426_v25 }
 0x10c   : > { %462 = vst [vmem:[#allocation2 + $0x48] sm:$0xff] %v428_v29 }
 0x10d   : > { %463 = vst [vmem:[#allocation2 + $0x40] sm:$0xff] %v431_v18 }
 0x10e   : > { %464 = vst [vmem:[#allocation2 + $0x20] sm:$0xff] %v433_v22 }
 0x10f   : > { %465 = vst [vmem:[#allocation2 + $0x10] sm:$0xff] %v436_v26 }
 0x110   : > { %466 = vst [vmem:[#allocation2 + $0x38] sm:$0xff] %v438_v30 }
 0x111   : > { %467 = vst [vmem:[#allocation2 + $0x60] sm:$0xff] %v1557_v19 }
 0x112   : > { %468 = vst [vmem:[#allocation2 + $0x70] sm:$0xff] %v1559_v23 }
 0x113   : > { %469 = vst [vmem:[#allocation2 + $0x78] sm:$0xff] %v1561_v27 }
 0x114   : > { %470 = vst [vmem:[#allocation2 + $0x28] sm:$0xff] %v1563_v31 }
 0x115 PF: > { %s1687_s29 = sld [smem:[#allocation14_spill]] }
 0x11b   : > { %p889_p4 = scmp.le.s32.totalorder %s1687_s29, 0 }
 0x11d   : > { %474 = sbr.rel (%p889_p4) target bundleno = 309 (0x135), region = 56 }
 0x122   : > { %v475_v32 = vld [vmem:[#allocation2 + $0x30] sm:$0xff]  ;;  %v476_v33 = vld [vmem:[#allocation2] sm:$0xff]  ;;  %v477_v34 = vld [vmem:[#allocation2 + $0x58] sm:$0xff] }
 0x123   : > { %v491_v35 = vadd.f32 %v475_v32, %v411_v16  ;;  %v492_v36 = vadd.f32 %v476_v33, %v413_v20  ;;  %v493_v37 = vadd.f32 %v477_v34, %v416_v24  ;;  %v478_v38 = vld [vmem:[#allocation2 + $0x18] sm:$0xff]  ;;  %v479_v39 = vld [vmem:[#allocation2 + $0x50] sm:$0xff]  ;;  %v480_v40 = vld [vmem:[#allocation2 + $0x68] sm:$0xff] }
 0x124   : > { %v494_v41 = vadd.f32 %v478_v38, %v418_v28  ;;  %v481_v42 = vld [vmem:[#allocation2 + $0x8] sm:$0xff]  ;;  %v495_v43 = vadd.f32 %v479_v39, %v421_v17  ;;  %v496_v45 = vadd.f32 %v480_v40, %v423_v21  ;;  %v483_v46 = vld [vmem:[#allocation2 + $0x40] sm:$0xff]  ;;  %v485_v50 = vld [vmem:[#allocation2 + $0x10] sm:$0xff] }
 0x125   : > { %507 = vst [vmem:[#allocation2 + $0x30] sm:$0xff] %v491_v35  ;;  %v482_v44 = vld [vmem:[#allocation2 + $0x48] sm:$0xff]  ;;  %v497_v47 = vadd.f32 %v481_v42, %v426_v25  ;;  %v484_v48 = vld [vmem:[#allocation2 + $0x20] sm:$0xff]  ;;  %v499_v51 = vadd.f32 %v483_v46, %v431_v18  ;;  %v486_v52 = vld [vmem:[#allocation2 + $0x38] sm:$0xff]  ;;  %v501_v55 = vadd.f32 %v485_v50, %v436_v26 }
 0x126   : > { %508 = vst [vmem:[#allocation2] sm:$0xff] %v492_v36  ;;  %v498_v49 = vadd.f32 %v482_v44, %v428_v29  ;;  %v500_v53 = vadd.f32 %v484_v48, %v433_v22  ;;  %v487_v54 = vld [vmem:[#allocation2 + $0x60] sm:$0xff]  ;;  %v488_v56 = vld [vmem:[#allocation2 + $0x70] sm:$0xff]  ;;  %v502_v57 = vadd.f32 %v486_v52, %v438_v30  ;;  %v489_v58 = vld [vmem:[#allocation2 + $0x78] sm:$0xff] }
 0x127   : > { %509 = vst [vmem:[#allocation2 + $0x58] sm:$0xff] %v493_v37  ;;  %v503_v59 = vadd.f32 %v487_v54, %v1557_v19  ;;  %v490_v60 = vld [vmem:[#allocation2 + $0x28] sm:$0xff]  ;;  %v504_v61 = vadd.f32 %v488_v56, %v1559_v23  ;;  %v505_v62 = vadd.f32 %v489_v58, %v1561_v27 }
 0x128   : > { %510 = vst [vmem:[#allocation2 + $0x18] sm:$0xff] %v494_v41  ;;  %v506_v63 = vadd.f32 %v490_v60, %v1563_v31 }
 0x129   : > { %511 = vst [vmem:[#allocation2 + $0x50] sm:$0xff] %v495_v43 }
 0x12a   : > { %512 = vst [vmem:[#allocation2 + $0x68] sm:$0xff] %v496_v45 }
 0x12b   : > { %513 = vst [vmem:[#allocation2 + $0x8] sm:$0xff] %v497_v47 }
 0x12c   : > { %514 = vst [vmem:[#allocation2 + $0x48] sm:$0xff] %v498_v49 }
 0x12d   : > { %515 = vst [vmem:[#allocation2 + $0x40] sm:$0xff] %v499_v51 }
 0x12e   : > { %516 = vst [vmem:[#allocation2 + $0x20] sm:$0xff] %v500_v53 }
 0x12f   : > { %517 = vst [vmem:[#allocation2 + $0x10] sm:$0xff] %v501_v55 }
 0x130   : > { %518 = vst [vmem:[#allocation2 + $0x38] sm:$0xff] %v502_v57 }
 0x131   : > { %519 = vst [vmem:[#allocation2 + $0x60] sm:$0xff] %v503_v59 }
 0x132   : > { %520 = vst [vmem:[#allocation2 + $0x70] sm:$0xff] %v504_v61 }
 0x133   : > { %521 = vst [vmem:[#allocation2 + $0x78] sm:$0xff] %v505_v62 }
 0x134   : > { %522 = vst [vmem:[#allocation2 + $0x28] sm:$0xff] %v506_v63 }
 0x135 PF: > { %s1688_s13 = sld [smem:[#allocation14_spill]] }
 0x13b   : > { %p890_p11 = scmp.ne.s32.totalorder %s1688_s13, 1 }
 0x13c   : > { %s1689_s18 = sld [smem:[#allocation21_spill]] (!%p890_p11) }
 0x13d   : > { %526 = sbr.rel (%p890_p11) target bundleno = 515 (0x203), region = 60 }
 0x142   : > { %v952_v0 = vld [vmem:[#allocation8 + $0x38] sm:$0xff]  ;;  %v951_v1 = vld [vmem:[#allocation8 + $0x30] sm:$0xff]  ;;  %v950_v2 = vld [vmem:[#allocation8 + $0x28] sm:$0xff] }
 0x143   : > { %619 = vmatpush.bf16.msra.mxu0 %v952_v0  ;;  %978 = vmatpush.bf16.msra.mxu1 %v952_v0  ;;  %v949_v3 = vld [vmem:[#allocation8 + $0x20] sm:$0xff]  ;;  %v948_v4 = vld [vmem:[#allocation8 + $0x18] sm:$0xff]  ;;  %v947_v5 = vld [vmem:[#allocation8 + $0x10] sm:$0xff] }
 0x144   : > { %979 = vmatpush.bf16.msra.mxu2 %v952_v0  ;;  %980 = vmatpush.bf16.msra.mxu3 %v952_v0  ;;  %v946_v6 = vld [vmem:[#allocation8 + $0x8] sm:$0xff]  ;;  %v945_v7 = vld [vmem:[#allocation8] sm:$0xff]  ;;  %v527_v8 = vld [vmem:[#allocation2 + $0x30] sm:$0xff] }
 0x145   : > { %v528_v9 = vld [vmem:[#allocation2] sm:$0xff]  ;;  %v531_v10 = vld [vmem:[#allocation2 + $0x50] sm:$0xff]  ;;  %v532_v11 = vld [vmem:[#allocation2 + $0x68] sm:$0xff] }
 0x146   : > { %v535_v12 = vld [vmem:[#allocation2 + $0x40] sm:$0xff]  ;;  %v540_v15 = vld [vmem:[#allocation2 + $0x70] sm:$0xff]  ;;  %v543_v16 = vpack.c.bf16 %v528_v9, %v527_v8  ;;  %v545_v17 = vpack.c.bf16 %v532_v11, %v531_v10  ;;  %v529_v20 = vld [vmem:[#allocation2 + $0x58] sm:$0xff] }
 0x147   : > { %620 = vmatpush.bf16.msra.mxu0 %v951_v1  ;;  %981 = vmatpush.bf16.msra.mxu1 %v951_v1  ;;  %v536_v13 = vld [vmem:[#allocation2 + $0x20] sm:$0xff]  ;;  %v530_v21 = vld [vmem:[#allocation2 + $0x18] sm:$0xff]  ;;  %v533_v22 = vld [vmem:[#allocation2 + $0x8] sm:$0xff] }
 0x148   : > { %982 = vmatpush.bf16.msra.mxu2 %v951_v1  ;;  %983 = vmatpush.bf16.msra.mxu3 %v951_v1  ;;  %v539_v14 = vld [vmem:[#allocation2 + $0x60] sm:$0xff]  ;;  %v547_v18 = vpack.c.bf16 %v536_v13, %v535_v12  ;;  %v534_v23 = vld [vmem:[#allocation2 + $0x48] sm:$0xff]  ;;  %v537_v24 = vld [vmem:[#allocation2 + $0x10] sm:$0xff]  ;;  %v544_v28 = vpack.c.bf16 %v530_v21, %v529_v20 }
 0x149   : > { %v549_v19 = vpack.c.bf16 %v540_v15, %v539_v14  ;;  %v538_v25 = vld [vmem:[#allocation2 + $0x38] sm:$0xff]  ;;  %v542_v27 = vld [vmem:[#allocation2 + $0x28] sm:$0xff]  ;;  %v546_v29 = vpack.c.bf16 %v534_v23, %v533_v22  ;;  %v1130_v32 = vld [vmem:[%s1689_s18] ss:$0 sm:$0xff] }
 0x14a   : > { %v541_v26 = vld [vmem:[#allocation2 + $0x78] sm:$0xff]  ;;  %v548_v30 = vpack.c.bf16 %v538_v25, %v537_v24 }
 0x14b   : > { %621 = vmatpush.bf16.msra.mxu0 %v950_v2  ;;  %984 = vmatpush.bf16.msra.mxu1 %v950_v2  ;;  %v550_v31 = vpack.c.bf16 %v542_v27, %v541_v26 }
 0x14c   : > { %985 = vmatpush.bf16.msra.mxu2 %v950_v2  ;;  %986 = vmatpush.bf16.msra.mxu3 %v950_v2 }
 0x14f   : > { %622 = vmatpush.bf16.msra.mxu0 %v949_v3  ;;  %987 = vmatpush.bf16.msra.mxu1 %v949_v3 }
 0x150   : > { %988 = vmatpush.bf16.msra.mxu2 %v949_v3  ;;  %989 = vmatpush.bf16.msra.mxu3 %v949_v3 }
 0x153   : > { %623 = vmatpush.bf16.msra.mxu0 %v948_v4  ;;  %990 = vmatpush.bf16.msra.mxu1 %v948_v4 }
 0x154   : > { %991 = vmatpush.bf16.msra.mxu2 %v948_v4  ;;  %992 = vmatpush.bf16.msra.mxu3 %v948_v4 }
 0x157   : > { %624 = vmatpush.bf16.msra.mxu0 %v947_v5  ;;  %993 = vmatpush.bf16.msra.mxu1 %v947_v5 }
 0x158   : > { %994 = vmatpush.bf16.msra.mxu2 %v947_v5  ;;  %995 = vmatpush.bf16.msra.mxu3 %v947_v5 }
 0x15b   : > { %625 = vmatpush.bf16.msra.mxu0 %v946_v6  ;;  %996 = vmatpush.bf16.msra.mxu1 %v946_v6 }
 0x15c   : > { %997 = vmatpush.bf16.msra.mxu2 %v946_v6  ;;  %998 = vmatpush.bf16.msra.mxu3 %v946_v6 }
 0x15f   : > { %626 = vmatpush.bf16.msra.mxu0 %v945_v7  ;;  %999 = vmatpush.bf16.msra.mxu1 %v945_v7 }
 0x160   : > { %1000 = vmatpush.bf16.msra.mxu2 %v945_v7  ;;  %1001 = vmatpush.bf16.msra.mxu3 %v945_v7 }
 0x162   : > { %627 = vmatmul.bf16.vlgmr.msra.gmra.mxu0 %v543_v16  ;;  %637 = vmatmul.bf16.vlgmr.msra.gmra.mxu1 %v545_v17 }
 0x163   : > { %647 = vmatmul.bf16.vlgmr.msra.gmra.mxu2 %v547_v18  ;;  %657 = vmatmul.bf16.vlgmr.msra.gmra.mxu3 %v549_v19 }
 0x172   : > { %632 = vmatmul.bf16.gmra.mxu0 %v544_v28  ;;  %642 = vmatmul.bf16.gmra.mxu1 %v546_v29 }
 0x173   : > { %652 = vmatmul.bf16.gmra.mxu2 %v548_v30  ;;  %662 = vmatmul.bf16.gmra.mxu3 %v550_v31 }
 0x1df   : > { %v628_v33 = vpop.f32.mrf.mxu0  ;;  %v638_v34 = vpop.f32.mrf.mxu1 }
 0x1e0   : > { %v629_v35 = vadd.f32 %v1130_v32, %v628_v33  ;;  %v639_v36 = vadd.f32 %v1130_v32, %v638_v34 }
 0x1e2   : > { %668 = vst [vmem:[%s1566_s28] sm:$0xff] %v629_v35 }
 0x1e3   : > { %672 = vst [vmem:[%s1566_s28 + $0x20] sm:$0xff] %v639_v36 }
 0x1e6   : > { %v648_v37 = vpop.f32.mrf.mxu2  ;;  %v658_v38 = vpop.f32.mrf.mxu3 }
 0x1e7   : > { %v649_v39 = vadd.f32 %v1130_v32, %v648_v37  ;;  %v659_v40 = vadd.f32 %v1130_v32, %v658_v38  ;;  %v630_v41 = vpop.f32.mrf.mxu0  ;;  %v640_v42 = vpop.f32.mrf.mxu1 }
 0x1e8   : > { %v631_v43 = vadd.f32 %v1130_v32, %v630_v41  ;;  %v641_v44 = vadd.f32 %v1130_v32, %v640_v42 }
 0x1e9   : > { %676 = vst [vmem:[%s1566_s28 + $0x40] sm:$0xff] %v649_v39 }
 0x1ea   : > { %680 = vst [vmem:[%s1566_s28 + $0x60] sm:$0xff] %v659_v40 }
 0x1eb   : > { %669 = vst [vmem:[%s1566_s28 + $0x8] sm:$0xff] %v631_v43 }
 0x1ec   : > { %673 = vst [vmem:[%s1566_s28 + $0x28] sm:$0xff] %v641_v44 }
 0x1ee   : > { %v650_v45 = vpop.f32.mrf.mxu2  ;;  %v660_v46 = vpop.f32.mrf.mxu3 }
 0x1ef   : > { %v651_v47 = vadd.f32 %v1130_v32, %v650_v45  ;;  %v661_v48 = vadd.f32 %v1130_v32, %v660_v46  ;;  %v633_v49 = vpop.f32.mrf.mxu0  ;;  %v643_v50 = vpop.f32.mrf.mxu1 }
 0x1f0   : > { %v634_v51 = vadd.f32 %v1130_v32, %v633_v49  ;;  %v644_v52 = vadd.f32 %v1130_v32, %v643_v50 }
 0x1f1   : > { %677 = vst [vmem:[%s1566_s28 + $0x48] sm:$0xff] %v651_v47 }
 0x1f2   : > { %681 = vst [vmem:[%s1566_s28 + $0x68] sm:$0xff] %v661_v48 }
 0x1f3   : > { %670 = vst [vmem:[%s1566_s28 + $0x10] sm:$0xff] %v634_v51 }
 0x1f4   : > { %674 = vst [vmem:[%s1566_s28 + $0x30] sm:$0xff] %v644_v52 }
 0x1f6   : > { %v653_v53 = vpop.f32.mrf.mxu2  ;;  %v663_v54 = vpop.f32.mrf.mxu3 }
 0x1f7   : > { %v654_v55 = vadd.f32 %v1130_v32, %v653_v53  ;;  %v664_v56 = vadd.f32 %v1130_v32, %v663_v54  ;;  %v635_v57 = vpop.f32.mrf.mxu0  ;;  %v645_v58 = vpop.f32.mrf.mxu1 }
 0x1f8   : > { %v636_v59 = vadd.f32 %v1130_v32, %v635_v57  ;;  %v646_v60 = vadd.f32 %v1130_v32, %v645_v58 }
 0x1f9   : > { %678 = vst [vmem:[%s1566_s28 + $0x50] sm:$0xff] %v654_v55 }
 0x1fa   : > { %682 = vst [vmem:[%s1566_s28 + $0x70] sm:$0xff] %v664_v56 }
 0x1fb   : > { %671 = vst [vmem:[%s1566_s28 + $0x18] sm:$0xff] %v636_v59 }
 0x1fc   : > { %675 = vst [vmem:[%s1566_s28 + $0x38] sm:$0xff] %v646_v60 }
 0x1fe   : > { %v655_v61 = vpop.f32.mrf.mxu2  ;;  %v665_v62 = vpop.f32.mrf.mxu3 }
 0x1ff   : > { %v656_v63 = vadd.f32 %v1130_v32, %v655_v61  ;;  %v666_v0 = vadd.f32 %v1130_v32, %v665_v62 }
 0x201   : > { %679 = vst [vmem:[%s1566_s28 + $0x58] sm:$0xff] %v656_v63 }
 0x202   : > { %683 = vst [vmem:[%s1566_s28 + $0x78] sm:$0xff] %v666_v0 }
 0x203 PF: > { %s1690_s9 = sld [smem:[#allocation15_spill]]  ;;  %s697_s21 = sshll.u32 %s1566_s28, 4  ;;  %s698_s21 = int_to_ptr.vmem [resolvable:$true] %s697_s21 }
 0x204   : > { %s1692_s22 = sld [smem:[#allocation22_spill]]  ;;  %s685_s6 = scalar_lea.sflag [#allocation5], %s264_s4 }
 0x209   : > { %s953_s7 = sshll.u32 %s1690_s9, 7 }
 0x20a   : > { %s1693_s30 = smov %s1692_s22  ;;  %s696_s3 = scalar_lea.hbm %s1692_s22, %s953_s7 }
 0x20b   : > { %s699_s5 = sshll.u32 %s696_s3, 4  ;;  %s1241_s14 = scalar_lea.hbm %s1693_s30, 256  ;;  %s700_s5 = int_to_ptr.hbm [resolvable:$true] %s699_s5 }
 0x20c   : > { %s1235_s8 = sshra.s32 %s700_s5, 4  ;;  %s1236_s8 = int_to_ptr.hbm [resolvable:$true] %s1235_s8 }
 0x20d   : > { %s1237_s12 = scalar_lea.hbm %s1236_s8, 128  ;;  %p1242_p5 = scmp.lt.s32.totalorder %s1236_s8, %s1693_s30 }
 0x20e   : > { %p1238_p0 = scmp.ne.s32.totalorder %s1236_s8, %s1237_s12  ;;  %p1243_p7 = scmp.lt.s32.totalorder %s1241_s14, %s1237_s12 }
 0x210   : > { %p1239_p2 = pnand %p1238_p0, %p1451_p6  ;;  %p1244_p8 = por %p1243_p7, %p1242_p5 }
 0x212   : > { %p1240_p3 = pneg %p1239_p2 }
 0x214   : > { %p1245_p9 = pnand %p1244_p8, %p1240_p3 }
 0x216   : > { %1248 = shalt.err (!%p1245_p9)
}
 0x217   : > { %s1354_s4 = smov 128   ;;  %s1355_s28 = smov 8  }
 0x218   : > { %1012 = dma.vmem_to_hbm [thread:$0]  (%p1451_p6), %s698_s21, 2048, %s700_s5, %s685_s6, %s1354_s4, %s1354_s4, %s1355_s28  }
 0x219 PF: > { %s1694_s9 = sld [smem:[#allocation13_spill]]  ;;  %p1034_p12 = scmp.ge.s32.totalorder %s1347_s25, 2 }
 0x21b   : > { %p1026_p13 = pnand %p1034_p12, %p1457_p10 }
 0x21d   : > { %p1027_p1 = pneg %p1026_p13 }
 0x21f   : > { %s714_s15 = sand.u32 1, %s1694_s9  }
 0x220   : > { %s715_s26 = scalar_lea.sflag [#allocation5], %s714_s15 }
 0x221   : > { %1302 = dma.done.wait (%p1027_p1), %s715_s26, 2048  }
 0x222   : > { %1304 = vsyncadd (%p1027_p1), %s715_s26, 4294965248  ;;  %s21_s25 = sadd.s32 1, %s1347_s25   ;;  %s1696_s11 = sld [smem:[#allocation18_spill]] }
 0x223   : > { %p18_p4 = scmp.ge.s32.totalorder %s21_s25, 6   ;;  %s1697_s15 = smov %s1311_s16 }
 0x224   : > { %s1698_s16 = smov %s1315_s17  ;;  %s1699_s17 = smov %s1505_s1 }
 0x225   : > { %s1700_s18 = smov %s1323_s19  ;;  %s1701_s19 = smov %s1327_s20 }
 0x226   : > { %s1702_s20 = smov %s1508_s2  ;;  %s1703_s21 = smov %s1339_s23 }
 0x227   : > { %s1704_s22 = smov %s1343_s24  ;;  %s1706_s24 = smov %s1712_s10 }
 0x228   : > { %s1705_s23 = smov %s1696_s11  ;;  %20 = sbr.rel (!%p18_p4) target bundleno = 15 (0xf), region = 102 }
 0x22d   :  { %721 = vsyncpa [#allocation4], 1 }
 0x22e   :  { %723 = vsyncpa [#allocation4 + $0x1], 1 }
 0x22f   :  { %724 = vsyncpa [#allocation7], 1 }
 0x230   :  { %725 = vsyncpa [#allocation5], 1 }
 0x231   :  { %727 = vsyncpa [#allocation5 + $0x1], 1 }

</bundles_post_ra>
